<compile_context>
chip_gen: v7x
topology: tpu7x:2x2x1
jax: 0.10.0
libtpu: 0.0.40
codegen_flags: <defaults>
</compile_context>

<pallas_src>
import jax
import jax.numpy as jnp
from jax.experimental import pallas as pl
from jax.experimental.pallas import tpu as pltpu


def _round_up(x, m):
    return ((x + m - 1) // m) * m


def critic_kernel(obs_ref, act_ref, w1o_ref, w1a_ref, w2_ref, w3_ref, b_ref,
                  out_ref):
    """Fused double-Q MLP over one batch tile.

    Shapes (H = hidden_dim, per grid step):
      obs_ref : [TILE_B, REPR] f32     act_ref : [TILE_B, ACT] f32
      w1o_ref : [2, REPR, H]   bf16    w1a_ref : [2, ACT, H]   bf16
      w2_ref  : [2, H, H]      bf16    w3_ref  : [2, H, 1]     bf16
      b_ref   : [2, 3, H]      f32  (row0=b1, row1=b2, row2[0]=b3, rest 0)
      out_ref : [TILE_B, 2]    f32  (col 0 = q1, col 1 = q2)
    """
    bf16 = jnp.bfloat16
    obs = obs_ref[...].astype(bf16)
    act = act_ref[...].astype(bf16)

    q_outs = []
    for q in range(2):                       # double-Q heads, statically unrolled
        b = b_ref[q]                         # [3, H] f32
        b1 = b[0:1, :]                       # [1, H]
        b2 = b[1:2, :]                       # [1, H]
        b3 = b[2:3, 0:1]                     # [1, 1]

        # Layer 1: concat([obs, action]) @ W1 folded into two matmuls
        # (f32 accumulation on the MXU).
        h = (jnp.dot(obs, w1o_ref[q], preferred_element_type=jnp.float32)
             + jnp.dot(act, w1a_ref[q], preferred_element_type=jnp.float32)
             + b1)
        h = jnp.maximum(h, 0.0)

        # Layer 2: per-head dense [TILE_B, H] x [H, H] (no zero-padded weight).
        h = jnp.dot(h.astype(bf16), w2_ref[q],
                    preferred_element_type=jnp.float32) + b2
        h = jnp.maximum(h, 0.0)

        # Layer 3: [TILE_B, H] x [H, 1].
        q_outs.append(jnp.dot(h.astype(bf16), w3_ref[q],
                              preferred_element_type=jnp.float32) + b3)

    out_ref[...] = jnp.concatenate(q_outs, axis=1)    # single [TILE_B, 2] store


def pack_critic_params(params, repr_dim, weight_dtype=jnp.bfloat16):
    """Pack the two per-head parameter lists into 5 dense (no-zero-fill) arrays."""
    heads = [params["q1"], params["q2"]]
    H = heads[0][2].shape[0]                                    # w2 is [H, H]

    w1o = jnp.stack([h[0][:repr_dim] for h in heads]).astype(weight_dtype)  # [2,REPR,H]
    w1a = jnp.stack([h[0][repr_dim:] for h in heads]).astype(weight_dtype)  # [2,ACT,H]
    w2 = jnp.stack([h[2] for h in heads]).astype(weight_dtype)              # [2,H,H]
    w3 = jnp.stack([h[4] for h in heads]).astype(weight_dtype)              # [2,H,1]

    bpack = jnp.zeros((2, 3, H), jnp.float32)
    for q, h in enumerate(heads):
        bpack = bpack.at[q, 0, :].set(h[1][0])
        bpack = bpack.at[q, 1, :].set(h[3][0])
        bpack = bpack.at[q, 2, 0].set(h[5][0, 0])

    return w1o, w1a, w2, w3, bpack


def critic_forward(obs, action, packed, *, tile_b=None):
    """obs: [B, repr_dim], action: [B, act_dim]; returns (q1, q2) each [B, 1]."""
    w1o, w1a, w2, w3, bpack = packed
    B, REPR = obs.shape
    ACT = action.shape[1]
    H = w2.shape[-1]
    D = REPR + ACT

    # Batch tile: 256 fills the 256x256 MXU on v6e/v7x; 128 suits v5e's 128x128
    # MXU and its smaller default scoped VMEM; tiny batches just round up to 8.
    if tile_b is None:
        if B >= 256:
            tile_b = 256
        elif B >= 128:
            tile_b = 128
        else:
            tile_b = max(8, _round_up(B, 8))

    B_pad = _round_up(B, tile_b)
    if B_pad != B:
        obs = jnp.pad(obs, ((0, B_pad - B), (0, 0)))
        action = jnp.pad(action, ((0, B_pad - B), (0, 0)))

    grid = (B_pad // tile_b,)

    weights = (w1o, w1a, w2, w3, bpack)
    weight_bytes = sum(int(a.size) * a.dtype.itemsize for a in weights)
    # Double-buffered batch tiles (in + out) and per-head f32/bf16 intermediates.
    tile_io_bytes = 2 * tile_b * (REPR + ACT + 2) * 4
    interm_bytes = 6 * tile_b * H * 4
    vmem_limit = min(
        int(1.25 * (weight_bytes + tile_io_bytes + interm_bytes)) + (8 << 20),
        48 << 20)  # stay well under v7x's 64 MiB physical VMEM

    flops = 2 * 2 * B_pad * (D * H + H * H + H)
    bytes_accessed = (int(obs.size) * 4 + int(action.size) * 4
                      + weight_bytes + B_pad * 2 * 4)

    out = pl.pallas_call(
        critic_kernel,
        out_shape=jax.ShapeDtypeStruct((B_pad, 2), jnp.float32),
        grid=grid,
        in_specs=[
            pl.BlockSpec((tile_b, REPR), lambda i: (i, 0)),      # obs tile
            pl.BlockSpec((tile_b, ACT), lambda i: (i, 0)),       # action tile
            pl.BlockSpec(w1o.shape, lambda i: (0, 0, 0)),        # resident weights
            pl.BlockSpec(w1a.shape, lambda i: (0, 0, 0)),
            pl.BlockSpec(w2.shape, lambda i: (0, 0, 0)),
            pl.BlockSpec(w3.shape, lambda i: (0, 0, 0)),
            pl.BlockSpec(bpack.shape, lambda i: (0, 0, 0)),
        ],
        out_specs=pl.BlockSpec((tile_b, 2), lambda i: (i, 0)),
        compiler_params=pltpu.CompilerParams(
            dimension_semantics=("parallel",),
            vmem_limit_bytes=vmem_limit),
        cost_estimate=pl.CostEstimate(
            flops=flops, transcendentals=0, bytes_accessed=bytes_accessed),
    )(obs, action, *weights)

    out = out[:B]
    return out[:, 0:1], out[:, 1:2]


def init_critic_params(key, repr_dim, action_dim, hidden_dim, hidden_depth=2):
    """Deterministic synthetic init (hidden_depth fixed to 2 in this kernel)."""
    assert hidden_depth == 2
    D = repr_dim + action_dim
    H = hidden_dim

    def linear(k, fan_in, fan_out):
        kw, kb = jax.random.split(k)
        scale = 1.0 / jnp.sqrt(fan_in)
        w = jax.random.uniform(kw, (fan_in, fan_out), jnp.float32, -scale, scale)
        b = jax.random.uniform(kb, (1, fan_out), jnp.float32, -scale, scale)
        return w, b

    keys = jax.random.split(key, 6)
    w1a, b1a = linear(keys[0], D, H)
    w2a, b2a = linear(keys[1], H, H)
    w3a, b3a = linear(keys[2], H, 1)
    w1b, b1b = linear(keys[3], D, H)
    w2b, b2b = linear(keys[4], H, H)
    w3b, b3b = linear(keys[5], H, 1)
    return {
        "q1": [w1a, b1a, w2a, b2a, w3a, b3a],
        "q2": [w1b, b1b, w2b, b2b, w3b, b3b],
    }


def critic_reference(obs, action, params):
    """Pure-JAX reference emulating the kernel's bf16-operand / f32-accum math."""
    def as_bf16_f32(x):
        return x.astype(jnp.bfloat16).astype(jnp.float32)

    x = jnp.concatenate([as_bf16_f32(obs), as_bf16_f32(action)], axis=-1)

    def mlp(p):
        w1, b1, w2, b2, w3, b3 = p
        h = jnp.dot(x, as_bf16_f32(w1), precision="highest") + b1
        h = jnp.maximum(h, 0.0)
        h = jnp.dot(as_bf16_f32(h), as_bf16_f32(w2), precision="highest") + b2
        h = jnp.maximum(h, 0.0)
        return jnp.dot(as_bf16_f32(h), as_bf16_f32(w3), precision="highest") + b3

    return mlp(params["q1"]), mlp(params["q2"])


if __name__ == "__main__":
    # Small shapes consistent with the module: repr_dim=32, action_dim=8,
    # hidden_dim=32, hidden_depth=2, batch=8.
    B, REPR, ACT, HID = 8, 32, 8, 32

    key = jax.random.PRNGKey(0)
    k_obs, k_act, k_par = jax.random.split(key, 3)
    obs = jax.random.normal(k_obs, (B, REPR), jnp.float32)
    action = jax.random.normal(k_act, (B, ACT), jnp.float32)
    params = init_critic_params(k_par, REPR, ACT, HID, hidden_depth=2)
    packed = pack_critic_params(params, REPR)

    q1, q2 = critic_forward(obs, action, packed)
    jax.block_until_ready((q1, q2))

    q1_ref, q2_ref = critic_reference(obs, action, params)
    assert q1.shape == (B, 1) and q2.shape == (B, 1)
    assert jnp.allclose(q1, q1_ref, atol=1e-3, rtol=1e-3)
    assert jnp.allclose(q2, q2_ref, atol=1e-3, rtol=1e-3)

    print("KERNEL_OK")
</pallas_src>

<mosaic_0001>
module attributes {stable_mosaic.version = 11 : i64} {
  func.func @critic_kernel(%arg0: i32, %arg1: memref<8x32xf32, #tpu.memory_space<vmem>>, %arg2: memref<8x8xf32, #tpu.memory_space<vmem>>, %arg3: memref<2x32x32xbf16, #tpu.memory_space<vmem>>, %arg4: memref<2x8x32xbf16, #tpu.memory_space<vmem>>, %arg5: memref<2x32x32xbf16, #tpu.memory_space<vmem>>, %arg6: memref<2x32x1xbf16, #tpu.memory_space<vmem>>, %arg7: memref<2x3x32xf32, #tpu.memory_space<vmem>>, %arg8: memref<8x2xf32, #tpu.memory_space<vmem>>) attributes {dimension_semantics = [#tpu.dimension_semantics<parallel>], iteration_bounds = array<i64: 1>, scalar_prefetch = 0 : i64, scratch_operands = 0 : i64, tpu.core_type = #tpu.core_type<tc>, window_params = [{transform_indices = @transform_0, window_bounds = array<i64: 8, 32>}, {transform_indices = @transform_1, window_bounds = array<i64: 8, 8>}, {pipeline_mode = #tpu.pipeline_mode<synchronous>, transform_indices = @transform_2, window_bounds = array<i64: 2, 32, 32>}, {pipeline_mode = #tpu.pipeline_mode<synchronous>, transform_indices = @transform_3, window_bounds = array<i64: 2, 8, 32>}, {pipeline_mode = #tpu.pipeline_mode<synchronous>, transform_indices = @transform_4, window_bounds = array<i64: 2, 32, 32>}, {pipeline_mode = #tpu.pipeline_mode<synchronous>, transform_indices = @transform_5, window_bounds = array<i64: 2, 32, 1>}, {pipeline_mode = #tpu.pipeline_mode<synchronous>, transform_indices = @transform_6, window_bounds = array<i64: 2, 3, 32>}, {transform_indices = @transform_7, window_bounds = array<i64: 8, 2>}]} {
    %c0 = arith.constant 0 : index
    %c0_0 = arith.constant 0 : index
    %0 = vector.load %arg1[%c0, %c0_0] : memref<8x32xf32, #tpu.memory_space<vmem>>, vector<8x32xf32>
    %1 = arith.truncf %0 : vector<8x32xf32> to vector<8x32xbf16>
    %c0_1 = arith.constant 0 : index
    %c0_2 = arith.constant 0 : index
    %2 = vector.load %arg2[%c0_1, %c0_2] : memref<8x8xf32, #tpu.memory_space<vmem>>, vector<8x8xf32>
    %3 = arith.truncf %2 : vector<8x8xf32> to vector<8x8xbf16>
    %c0_3 = arith.constant 0 : index
    %c0_4 = arith.constant 0 : index
    %c0_5 = arith.constant 0 : index
    %4 = vector.load %arg7[%c0_3, %c0_4, %c0_5] : memref<2x3x32xf32, #tpu.memory_space<vmem>>, vector<1x3x32xf32>
    %5 = vector.shape_cast %4 : vector<1x3x32xf32> to vector<3x32xf32>
    %6 = vector.extract_strided_slice %5 {offsets = [0, 0], sizes = [1, 32], strides = [1, 1]} : vector<3x32xf32> to vector<1x32xf32>
    %7 = vector.extract_strided_slice %5 {offsets = [1, 0], sizes = [1, 32], strides = [1, 1]} : vector<3x32xf32> to vector<1x32xf32>
    %8 = vector.extract_strided_slice %5 {offsets = [2, 0], sizes = [1, 1], strides = [1, 1]} : vector<3x32xf32> to vector<1x1xf32>
    %c0_6 = arith.constant 0 : index
    %c0_7 = arith.constant 0 : index
    %c0_8 = arith.constant 0 : index
    %9 = vector.load %arg3[%c0_6, %c0_7, %c0_8] : memref<2x32x32xbf16, #tpu.memory_space<vmem>>, vector<1x32x32xbf16>
    %10 = vector.shape_cast %9 : vector<1x32x32xbf16> to vector<32x32xbf16>
    %cst = arith.constant dense<0.000000e+00> : vector<8x32xf32>
    %11 = tpu.matmul %1, %10, %cst {dimension_numbers = #tpu.dot_dimension_numbers<[1], [0], [0], [1], [0, 0, 1, 1], [], []>} : vector<8x32xbf16>, vector<32x32xbf16>, vector<8x32xf32> -> vector<8x32xf32>
    %c0_9 = arith.constant 0 : index
    %c0_10 = arith.constant 0 : index
    %c0_11 = arith.constant 0 : index
    %12 = vector.load %arg4[%c0_9, %c0_10, %c0_11] : memref<2x8x32xbf16, #tpu.memory_space<vmem>>, vector<1x8x32xbf16>
    %13 = vector.shape_cast %12 : vector<1x8x32xbf16> to vector<8x32xbf16>
    %cst_12 = arith.constant dense<0.000000e+00> : vector<8x32xf32>
    %14 = tpu.matmul %3, %13, %cst_12 {dimension_numbers = #tpu.dot_dimension_numbers<[1], [0], [0], [1], [0, 0, 1, 1], [], []>} : vector<8x8xbf16>, vector<8x32xbf16>, vector<8x32xf32> -> vector<8x32xf32>
    %15 = arith.addf %11, %14 : vector<8x32xf32>
    %16 = vector.broadcast %6 : vector<1x32xf32> to vector<8x32xf32>
    %17 = arith.addf %15, %16 : vector<8x32xf32>
    %cst_13 = arith.constant 0.000000e+00 : f32
    %18 = vector.broadcast %cst_13 : f32 to vector<8x32xf32>
    %19 = arith.maximumf %17, %18 : vector<8x32xf32>
    %20 = arith.truncf %19 : vector<8x32xf32> to vector<8x32xbf16>
    %c0_14 = arith.constant 0 : index
    %c0_15 = arith.constant 0 : index
    %c0_16 = arith.constant 0 : index
    %21 = vector.load %arg5[%c0_14, %c0_15, %c0_16] : memref<2x32x32xbf16, #tpu.memory_space<vmem>>, vector<1x32x32xbf16>
    %22 = vector.shape_cast %21 : vector<1x32x32xbf16> to vector<32x32xbf16>
    %cst_17 = arith.constant dense<0.000000e+00> : vector<8x32xf32>
    %23 = tpu.matmul %20, %22, %cst_17 {dimension_numbers = #tpu.dot_dimension_numbers<[1], [0], [0], [1], [0, 0, 1, 1], [], []>} : vector<8x32xbf16>, vector<32x32xbf16>, vector<8x32xf32> -> vector<8x32xf32>
    %24 = vector.broadcast %7 : vector<1x32xf32> to vector<8x32xf32>
    %25 = arith.addf %23, %24 : vector<8x32xf32>
    %cst_18 = arith.constant 0.000000e+00 : f32
    %26 = vector.broadcast %cst_18 : f32 to vector<8x32xf32>
    %27 = arith.maximumf %25, %26 : vector<8x32xf32>
    %28 = arith.truncf %27 : vector<8x32xf32> to vector<8x32xbf16>
    %c0_19 = arith.constant 0 : index
    %c0_20 = arith.constant 0 : index
    %c0_21 = arith.constant 0 : index
    %29 = vector.load %arg6[%c0_19, %c0_20, %c0_21] : memref<2x32x1xbf16, #tpu.memory_space<vmem>>, vector<1x32x1xbf16>
    %30 = vector.shape_cast %29 : vector<1x32x1xbf16> to vector<32x1xbf16>
    %cst_22 = arith.constant dense<0.000000e+00> : vector<8x1xf32>
    %31 = tpu.matmul %28, %30, %cst_22 {dimension_numbers = #tpu.dot_dimension_numbers<[1], [0], [0], [1], [0, 0, 1, 1], [], []>} : vector<8x32xbf16>, vector<32x1xbf16>, vector<8x1xf32> -> vector<8x1xf32>
    %32 = vector.broadcast %8 : vector<1x1xf32> to vector<8x1xf32>
    %33 = arith.addf %31, %32 : vector<8x1xf32>
    %c1 = arith.constant 1 : index
    %c0_23 = arith.constant 0 : index
    %c0_24 = arith.constant 0 : index
    %34 = vector.load %arg7[%c1, %c0_23, %c0_24] : memref<2x3x32xf32, #tpu.memory_space<vmem>>, vector<1x3x32xf32>
    %35 = vector.shape_cast %34 : vector<1x3x32xf32> to vector<3x32xf32>
    %36 = vector.extract_strided_slice %35 {offsets = [0, 0], sizes = [1, 32], strides = [1, 1]} : vector<3x32xf32> to vector<1x32xf32>
    %37 = vector.extract_strided_slice %35 {offsets = [1, 0], sizes = [1, 32], strides = [1, 1]} : vector<3x32xf32> to vector<1x32xf32>
    %38 = vector.extract_strided_slice %35 {offsets = [2, 0], sizes = [1, 1], strides = [1, 1]} : vector<3x32xf32> to vector<1x1xf32>
    %c1_25 = arith.constant 1 : index
    %c0_26 = arith.constant 0 : index
    %c0_27 = arith.constant 0 : index
    %39 = vector.load %arg3[%c1_25, %c0_26, %c0_27] : memref<2x32x32xbf16, #tpu.memory_space<vmem>>, vector<1x32x32xbf16>
    %40 = vector.shape_cast %39 : vector<1x32x32xbf16> to vector<32x32xbf16>
    %cst_28 = arith.constant dense<0.000000e+00> : vector<8x32xf32>
    %41 = tpu.matmul %1, %40, %cst_28 {dimension_numbers = #tpu.dot_dimension_numbers<[1], [0], [0], [1], [0, 0, 1, 1], [], []>} : vector<8x32xbf16>, vector<32x32xbf16>, vector<8x32xf32> -> vector<8x32xf32>
    %c1_29 = arith.constant 1 : index
    %c0_30 = arith.constant 0 : index
    %c0_31 = arith.constant 0 : index
    %42 = vector.load %arg4[%c1_29, %c0_30, %c0_31] : memref<2x8x32xbf16, #tpu.memory_space<vmem>>, vector<1x8x32xbf16>
    %43 = vector.shape_cast %42 : vector<1x8x32xbf16> to vector<8x32xbf16>
    %cst_32 = arith.constant dense<0.000000e+00> : vector<8x32xf32>
    %44 = tpu.matmul %3, %43, %cst_32 {dimension_numbers = #tpu.dot_dimension_numbers<[1], [0], [0], [1], [0, 0, 1, 1], [], []>} : vector<8x8xbf16>, vector<8x32xbf16>, vector<8x32xf32> -> vector<8x32xf32>
    %45 = arith.addf %41, %44 : vector<8x32xf32>
    %46 = vector.broadcast %36 : vector<1x32xf32> to vector<8x32xf32>
    %47 = arith.addf %45, %46 : vector<8x32xf32>
    %cst_33 = arith.constant 0.000000e+00 : f32
    %48 = vector.broadcast %cst_33 : f32 to vector<8x32xf32>
    %49 = arith.maximumf %47, %48 : vector<8x32xf32>
    %50 = arith.truncf %49 : vector<8x32xf32> to vector<8x32xbf16>
    %c1_34 = arith.constant 1 : index
    %c0_35 = arith.constant 0 : index
    %c0_36 = arith.constant 0 : index
    %51 = vector.load %arg5[%c1_34, %c0_35, %c0_36] : memref<2x32x32xbf16, #tpu.memory_space<vmem>>, vector<1x32x32xbf16>
    %52 = vector.shape_cast %51 : vector<1x32x32xbf16> to vector<32x32xbf16>
    %cst_37 = arith.constant dense<0.000000e+00> : vector<8x32xf32>
    %53 = tpu.matmul %50, %52, %cst_37 {dimension_numbers = #tpu.dot_dimension_numbers<[1], [0], [0], [1], [0, 0, 1, 1], [], []>} : vector<8x32xbf16>, vector<32x32xbf16>, vector<8x32xf32> -> vector<8x32xf32>
    %54 = vector.broadcast %37 : vector<1x32xf32> to vector<8x32xf32>
    %55 = arith.addf %53, %54 : vector<8x32xf32>
    %cst_38 = arith.constant 0.000000e+00 : f32
    %56 = vector.broadcast %cst_38 : f32 to vector<8x32xf32>
    %57 = arith.maximumf %55, %56 : vector<8x32xf32>
    %58 = arith.truncf %57 : vector<8x32xf32> to vector<8x32xbf16>
    %c1_39 = arith.constant 1 : index
    %c0_40 = arith.constant 0 : index
    %c0_41 = arith.constant 0 : index
    %59 = vector.load %arg6[%c1_39, %c0_40, %c0_41] : memref<2x32x1xbf16, #tpu.memory_space<vmem>>, vector<1x32x1xbf16>
    %60 = vector.shape_cast %59 : vector<1x32x1xbf16> to vector<32x1xbf16>
    %cst_42 = arith.constant dense<0.000000e+00> : vector<8x1xf32>
    %61 = tpu.matmul %58, %60, %cst_42 {dimension_numbers = #tpu.dot_dimension_numbers<[1], [0], [0], [1], [0, 0, 1, 1], [], []>} : vector<8x32xbf16>, vector<32x1xbf16>, vector<8x1xf32> -> vector<8x1xf32>
    %62 = vector.broadcast %38 : vector<1x1xf32> to vector<8x1xf32>
    %63 = arith.addf %61, %62 : vector<8x1xf32>
    %64 = tpu.concatenate %33, %63 in 1 : vector<8x1xf32>, vector<8x1xf32> -> vector<8x2xf32>
    %c0_43 = arith.constant 0 : index
    %c0_44 = arith.constant 0 : index
    %65 = vector.load %arg8[%c0_43, %c0_44] : memref<8x2xf32, #tpu.memory_space<vmem>>, vector<8x2xf32>
    tpu.vector_store %arg8[%c0_43, %c0_44], %64 {strides = array<i32>} : memref<8x2xf32, #tpu.memory_space<vmem>>, vector<8x2xf32>,
    return
  }
  func.func @transform_0(%arg0: i32) -> (i32, i32) {
    %c0_i32 = arith.constant 0 : i32
    %c0_i32_0 = arith.constant 0 : i32
    return %arg0, %c0_i32 : i32, i32
  }
  func.func @transform_1(%arg0: i32) -> (i32, i32) {
    %c0_i32 = arith.constant 0 : i32
    %c0_i32_0 = arith.constant 0 : i32
    return %arg0, %c0_i32 : i32, i32
  }
  func.func @transform_2(%arg0: i32) -> (i32, i32, i32) {
    %c0_i32 = arith.constant 0 : i32
    %c0_i32_0 = arith.constant 0 : i32
    %c0_i32_1 = arith.constant 0 : i32
    %c0_i32_2 = arith.constant 0 : i32
    return %c0_i32, %c0_i32_0, %c0_i32_1 : i32, i32, i32
  }
  func.func @transform_3(%arg0: i32) -> (i32, i32, i32) {
    %c0_i32 = arith.constant 0 : i32
    %c0_i32_0 = arith.constant 0 : i32
    %c0_i32_1 = arith.constant 0 : i32
    %c0_i32_2 = arith.constant 0 : i32
    return %c0_i32, %c0_i32_0, %c0_i32_1 : i32, i32, i32
  }
  func.func @transform_4(%arg0: i32) -> (i32, i32, i32) {
    %c0_i32 = arith.constant 0 : i32
    %c0_i32_0 = arith.constant 0 : i32
    %c0_i32_1 = arith.constant 0 : i32
    %c0_i32_2 = arith.constant 0 : i32
    return %c0_i32, %c0_i32_0, %c0_i32_1 : i32, i32, i32
  }
  func.func @transform_5(%arg0: i32) -> (i32, i32, i32) {
    %c0_i32 = arith.constant 0 : i32
    %c0_i32_0 = arith.constant 0 : i32
    %c0_i32_1 = arith.constant 0 : i32
    %c0_i32_2 = arith.constant 0 : i32
    return %c0_i32, %c0_i32_0, %c0_i32_1 : i32, i32, i32
  }
  func.func @transform_6(%arg0: i32) -> (i32, i32, i32) {
    %c0_i32 = arith.constant 0 : i32
    %c0_i32_0 = arith.constant 0 : i32
    %c0_i32_1 = arith.constant 0 : i32
    %c0_i32_2 = arith.constant 0 : i32
    return %c0_i32, %c0_i32_0, %c0_i32_1 : i32, i32, i32
  }
  func.func @transform_7(%arg0: i32) -> (i32, i32) {
    %c0_i32 = arith.constant 0 : i32
    %c0_i32_0 = arith.constant 0 : i32
    return %arg0, %c0_i32 : i32, i32
  }
}

</mosaic_0001>

<bundles_post_ra>
// kernel: tpu_custom_call.1
= control target key start
LH: loop header
LB: loop body
LE: loop exit
PB: predicated region body
PF: predicated region fallthrough
CT: control target
= control target key end

     0   :  { %12 = vsyncpa [#allocation3], 0  ;;  %s698_s24 = smov [#allocation2]   ;;  %s851_s0 = inlined_call_operand.vmem [shape: f32[8,32], index: 0, kind: input, shape index: {}]   ;;  %s852_s1 = inlined_call_operand.vmem [shape: f32[8,8], index: 1, kind: input, shape index: {}]   ;;  %s853_s2 = inlined_call_operand.vmem [shape: bf16[2,32,32], index: 2, kind: input, shape index: {}]   ;;  %s854_s3 = inlined_call_operand.vmem [shape: bf16[2,8,32], index: 3, kind: input, shape index: {}]   ;;  %s855_s4 = inlined_call_operand.hbm [shape: bf16[2,32,32], index: 4, kind: input, shape index: {}]   ;;  %s856_s5 = inlined_call_operand.vmem [shape: bf16[2,32,1], index: 5, kind: input, shape index: {}]   ;;  %s857_s6 = inlined_call_operand.vmem [shape: f32[2,3,32], index: 6, kind: input, shape index: {}]   ;;  %s858_s7 = inlined_call_operand.vmem [shape: f32[8,2], index: 7, kind: output, shape index: {}]  }
   0x1   :  { %s26_s25 = sshll.u32 %s698_s24, 4  ;;  %s674_s28 = scalar_lea.hbm %s855_s4, 512  ;;  %s27_s25 = int_to_ptr.vmem [resolvable:$true] %s26_s25 }
   0x2   :  { %p675_p0 = scmp.ne.s32.totalorder %s855_s4, %s674_s28  ;;  %p678_p1 = scmp.lt.u32.totalorder %s674_s28, %s855_s4 }
   0x4   :  { %p680_p2 = pnand %p678_p1, %p675_p0 }
   0x6   :  { %683 = shalt.err (!%p680_p2)
}
   0x7   :  { %s684_s10 = scalar_lea.vmem %s27_s25, 512  ;;  %p689_p4 = scmp.lt.s32.totalorder %s27_s25, %s27_s25 }
   0x8   :  { %p685_p3 = scmp.ne.s32.totalorder %s27_s25, %s684_s10  ;;  %p690_p5 = scmp.lt.s32.totalorder %s684_s10, %s684_s10 }
   0xa   :  { %p691_p6 = por %p690_p5, %p689_p4 }
   0xc   :  { %p692_p7 = pnand %p691_p6, %p685_p3 }
   0xe   :  { %695 = shalt.err (!%p692_p7)
}
   0xf   :  { %s699_s11 = smov 64   ;;  %s700_s12 = smov 4  }
  0x10   :  { %32 = dma.hbm_to_vmem [thread:$0]  %s855_s4, 512, %s27_s25, [#allocation3], %s699_s11, %s699_s11, %s700_s12  }
  0x11   :  { %696 = dma.done.wait [#allocation3], 512  }
  0x12   :  { %697 = vsyncadd [#allocation3], 4294966784  ;;  %v701_v0 = vmov 0.0   ;;  %vm702_vm0 = vmmov 0   ;;  %vm55_vm1 = vcmask 1043456   ;;  %v662_v1 = vld [vmem:[%s853_s2] sm:$0xff]   ;;  %v155_v12 = vlaneseq }
  0x13   :  { %602 = vmatprep.subr.bf16.mxu1 %v701_v0  ;;  %596 = vmatprep.subr.bf16.mxu0 %v701_v0  ;;  %v50_v2 = vld [vmem:[%s854_s3] sm:$0xf]  ;;  %vm51_vm2 = vcmask 64512   ;;  %v663_v6 = vld [vmem:[%s853_s2 + $0x8] sm:$0xff]   ;;  %vm111_vm3 = vcmask 261120   ;;  %v668_v40 = vld [vmem:[%s853_s2 + $0x10] sm:$0xff]  }
  0x14   :  { %598 = vmatprep.mubr.msk.bf16.mxu0 %vm702_vm0, %v701_v0  ;;  %606 = vmatprep.mubr.msk.bf16.mxu1 %vm702_vm0, %v701_v0  ;;  %v43_v3 = vld [vmem:[%s852_s1] sm:$0xff]  ;;  %v57_v4 = vsel %vm55_vm1, %v50_v2, 0  ;;  %v665_v10 = vld [vmem:[#allocation2 + $0x8] sm:$0xff]   ;;  %v793_v13 = vshrl.u32 %v155_v12, 7  ;;  %v669_v42 = vld [vmem:[%s853_s2 + $0x18] sm:$0xff]   ;;  %vm535_vm4 = vcmask 7168  }
  0x15   :  { %603 = vmatpush3.bf16.msra.mxu1 %v662_v1  ;;  %v44_v5 = vpack.c.bf16 %v43_v3, %v43_v3  ;;  %597 = vmatpush3.bf16.msra.mxu0 %v57_v4  ;;  %v41_v7 = vld [vmem:[%s851_s0] sm:$0xff]  ;;  %v667_v31 = vld [vmem:[%s856_s5 + $0x8] sm:$0xff]   ;;  %v670_v47 = vld [vmem:[#allocation2 + $0x10] sm:$0xff]   ;;  %vm537_vm5 = vcmask 15360  }
  0x16   :  { %604 = vmatprep.subr.bf16.mxu1 %v701_v0  ;;  %610 = vmatprep.subr.bf16.mxu0 %v701_v0  ;;  %v42_v8 = vpack.c.bf16 %v41_v7, %v41_v7  ;;  %v664_v9 = vld [vmem:[#allocation2] sm:$0xff]   ;;  %v157_v14 = vsub.s32 0, %v793_v13  ;;  %v168_v32 = vsub.s32 1, %v793_v13  ;;  %v671_v48 = vld [vmem:[#allocation2 + $0x18] sm:$0xff]   ;;  %v672_v49 = vld [vmem:[%s856_s5 + $0x10] sm:$0xff]  }
  0x17   :  { %v666_v11 = vld [vmem:[%s856_s5] sm:$0xff]  }
  0x18   :  { %599 = vmatmul.mubr.msk.bf16.vlgmr.msra.gmra.mrb[0].mxu0 %vm51_vm2, %v44_v5  ;;  %v799_v15 = vld [vmem:[%s857_s6] sm:$0x7]  ;;  %v559_v27 = vld [vmem:[%s854_s3 + $0x4] sm:$0xf] }
  0x19   :  { %605 = vmatpush3.bf16.msra.mxu1 %v663_v6  ;;  %614 = vmatprep.mubr.msk.bf16.mxu0 %vm702_vm0, %v701_v0  ;;  %v158_v19 = vrot.slane %v799_v15, %v157_v14  ;;  %v300_v29 = vsel %vm55_vm1, %v559_v27, 0  ;;  %v169_v33 = vrot.slane %v799_v15, %v168_v32  ;;  %v554_v54 = vld [vmem:[%s857_s6 + $0x4] sm:$0x7] }
  0x1a   :  { %618 = vmatprep.subr.bf16.mxu1 %v701_v0  ;;  %611 = vmatpush3.bf16.msra.mxu0 %v664_v9  ;;  %v397_v55 = vrot.slane %v554_v54, %v157_v14  ;;  %v409_v1 = vrot.slane %v554_v54, %v168_v32  ;;  %v233_v9 = vsub.s32 2, %v793_v13 }
  0x1b   :  { %612 = vmatprep.subr.bf16.mxu0 %v701_v0 }
  0x1c   :  { %607 = vmatmul.mubr.msk.bf16.vlgmr.msra.gmra.mrb[0].mxu1 %vm111_vm3, %v42_v8 }
  0x1d   :  { %622 = vmatprep.mubr.msk.bf16.mxu1 %vm702_vm0, %v701_v0  ;;  %619 = vmatpush3.bf16.msra.mxu1 %v666_v11 }
  0x1e   :  { %613 = vmatpush3.bf16.msra.mxu0 %v665_v10  ;;  %620 = vmatprep.subr.bf16.mxu1 %v701_v0  ;;  %v475_v10 = vrot.slane %v554_v54, %v233_v9 }
  0x1f   :  { %626 = vmatprep.subr.bf16.mxu0 %v701_v0 }
  0x21   :  { %621 = vmatpush3.bf16.msra.mxu1 %v667_v31 }
  0x22   :  { %632 = vmatprep.subr.bf16.mxu1 %v701_v0 }
  0xeb   :  { %v93_v16 = vpop.f32.mrb[0].mxu0 }
  0xec   :  { %v600_v17 = vpop.f32.mrb[1].mxu0 }
  0xed   :  { %v96_v18 = vpop.f32.mrb[2].mxu0 }
  0xee   :  { %v601_v20 = vpop.f32.mrb[3].mxu0  ;;  %v234_v18 = vrot.slane %v799_v15, %v233_v9 }
  0xef   :  { %v149_v21 = vpop.f32.mrb[0].mxu1 }
  0xf0   :  { %v150_v22 = vadd.f32 %v149_v21, %v93_v16  ;;  %v608_v23 = vpop.f32.mrb[1].mxu1 }
  0xf1   :  { %v152_v24 = vpop.f32.mrb[2].mxu1 }
  0xf2   :  { %v159_v25 = vadd.f32 %v158_v19, %v150_v22  ;;  %v609_v26 = vpop.f32.mrb[3].mxu1 }
  0xf4   :  { %v160_v28 = vmax.f32 %v159_v25, 0.0 }
  0xf6   :  { %v161_v30 = vpack.c.bf16 %v160_v28, %v160_v28 }
  0xf8   :  { %615 = vmatmul.mubr.msk.bf16.vlgmr.msra.gmra.mrb[4].mxu0 %vm111_vm3, %v161_v30 }
  0xf9   :  { %627 = vmatpush3.bf16.msra.mxu0 %v300_v29  ;;  %628 = vmatprep.mubr.msk.bf16.mxu0 %vm702_vm0, %v701_v0 }
  0xfa   :  { %640 = vmatprep.subr.bf16.mxu0 %v701_v0 }
 0x100   :  { %629 = vmatmul.mubr.msk.bf16.vlgmr.msra.gmra.mrb[8].mxu0 %vm51_vm2, %v44_v5 }
 0x101   :  { %644 = vmatprep.mubr.msk.bf16.mxu0 %vm702_vm0, %v701_v0  ;;  %641 = vmatpush3.bf16.msra.mxu0 %v670_v47 }
 0x102   :  { %642 = vmatprep.subr.bf16.mxu0 %v701_v0 }
 0x105   :  { %643 = vmatpush3.bf16.msra.mxu0 %v671_v48 }
 0x1cb   :  { %v219_v34 = vpop.f32.mrb[4].mxu0 }
 0x1cc   :  { %v220_v35 = vadd.f32 %v219_v34, %v169_v33  ;;  %v616_v36 = vpop.f32.mrb[5].mxu0 }
 0x1cd   :  { %v222_v37 = vpop.f32.mrb[6].mxu0 }
 0x1ce   :  { %v225_v38 = vmax.f32 %v220_v35, 0.0  ;;  %v617_v39 = vpop.f32.mrb[7].mxu0 }
 0x1d0   :  { %v226_v41 = vpack.c.bf16 %v225_v38, %v225_v38 }
 0x1d2   :  { %623 = vmatmul.mubr.msk.bf16.vlgmr.msra.gmra.mrb[4].mxu1 %vm111_vm3, %v226_v41 }
 0x1d3   :  { %633 = vmatpush3.bf16.msra.mxu1 %v668_v40  ;;  %636 = vmatprep.mubr.msk.bf16.mxu1 %vm702_vm0, %v701_v0  ;;  %v336_v43 = vpop.f32.mrb[8].mxu0 }
 0x1d4   :  { %634 = vmatprep.subr.bf16.mxu1 %v701_v0  ;;  %v630_v44 = vpop.f32.mrb[9].mxu0 }
 0x1d5   :  { %v339_v45 = vpop.f32.mrb[10].mxu0 }
 0x1d6   :  { %v631_v46 = vpop.f32.mrb[11].mxu0 }
 0x1d7   :  { %635 = vmatpush3.bf16.msra.mxu1 %v669_v42 }
 0x1d8   :  { %648 = vmatprep.subr.bf16.mxu1 %v701_v0 }
 0x1da   :  { %637 = vmatmul.mubr.msk.bf16.vlgmr.msra.gmra.mrb[8].mxu1 %vm111_vm3, %v42_v8 }
 0x1db   :  { %652 = vmatprep.mubr.msk.bf16.mxu1 %vm702_vm0, %v701_v0  ;;  %649 = vmatpush3.bf16.msra.mxu1 %v672_v49 }
 0x1dc   :  { %650 = vmatprep.subr.bf16.mxu1 %v701_v0  ;;  %v673_v0 = vld [vmem:[%s856_s5 + $0x18] sm:$0xff]   ;;  %s703_s5 = smov 1  }
 0x1df   :  { %651 = vmatpush3.bf16.msra.mxu1 %v673_v0 }
 0x2a5   :  { %v284_v50 = vpop.f32.mrb[4].mxu1 }
 0x2a6   :  { %v624_v51 = vpop.f32.mrb[5].mxu1  ;;  %v285_v19 = vadd.f32 %v284_v50, %v234_v18 }
 0x2a7   :  { %v287_v52 = vpop.f32.mrb[6].mxu1 }
 0x2a8   :  { %v625_v53 = vpop.f32.mrb[7].mxu1 }
 0x2ad   :  { %v388_v56 = vpop.f32.mrb[8].mxu1 }
 0x2ae   :  { %v389_v57 = vadd.f32 %v388_v56, %v336_v43  ;;  %v638_v58 = vpop.f32.mrb[9].mxu1 }
 0x2af   :  { %v391_v59 = vpop.f32.mrb[10].mxu1 }
 0x2b0   :  { %v398_v60 = vadd.f32 %v397_v55, %v389_v57  ;;  %v639_v61 = vpop.f32.mrb[11].mxu1 }
 0x2b2   :  { %v399_v62 = vmax.f32 %v398_v60, 0.0 }
 0x2b4   :  { %v400_v63 = vpack.c.bf16 %v399_v62, %v399_v62 }
 0x2b6   :  { %645 = vmatmul.mubr.msk.bf16.vlgmr.msra.gmra.mrb[12].mxu0 %vm111_vm3, %v400_v63 }
 0x389   :  { %v459_v2 = vpop.f32.mrb[12].mxu0 }
 0x38a   :  { %v460_v3 = vadd.f32 %v459_v2, %v409_v1  ;;  %v646_v4 = vpop.f32.mrb[13].mxu0 }
 0x38b   :  { %v462_v5 = vpop.f32.mrb[14].mxu0 }
 0x38c   :  { %v465_v6 = vmax.f32 %v460_v3, 0.0  ;;  %v647_v7 = vpop.f32.mrb[15].mxu0 }
 0x38e   :  { %v466_v8 = vpack.c.bf16 %v465_v6, %v465_v6 }
 0x390   :  { %653 = vmatmul.mubr.msk.bf16.vlgmr.msra.gmra.mrb[12].mxu1 %vm111_vm3, %v466_v8 }
 0x463   :  { %v525_v11 = vpop.f32.mrb[12].mxu1 }
 0x464   :  { %v526_v12 = vadd.f32 %v525_v11, %v475_v10  ;;  %v654_v14 = vpop.f32.mrb[13].mxu1 }
 0x465   :  { %v528_v16 = vpop.f32.mrb[14].mxu1 }
 0x466   :  { %v655_v17 = vpop.f32.mrb[15].mxu1  ;;  %532 = vrot.lane.b32.xlu0 %v526_v12, %s703_s5 }
 0x4d8   :  { %v533_v20 = vpop.permute.xlu0 %532 }
 0x4d9   :  { %v536_v21 = vsel %vm535_vm4, %v285_v19, %v533_v20 }
 0x4da   :  { %538 = vst.msk [vmem:[%s858_s7] sm:$0xff] %vm537_vm5, %v536_v21 }
 0x4db   :  { %543 = vsyncpa [#allocation3], 1 }

</bundles_post_ra>
